<compile_context>
chip_gen: v7x
topology: tpu7x:2x2x1
jax: 0.10.0
libtpu: 0.0.40
codegen_flags: <defaults>
</compile_context>

<pallas_src>
import functools

import jax
import jax.numpy as jnp
from jax.experimental import pallas as pl
from jax.experimental.pallas import tpu as pltpu

K_PAD = 16          # padded fan-in (sublane) width; all fan_in in {10, 8, 4, 8}
F_PAD = 128         # lane-dense padded fan-out width for every layer
TILE_B_MAX = 1024   # max batch rows per grid step
PALLAS_MIN_BATCH = 512  # below this, plain jnp is cheaper than a kernel launch


def _round_up(n, m):
    return ((n + m - 1) // m) * m


def _autoencoder_kernel(x_ref, w_ref, b_ref, out_ref, xpad_ref):
    """x_ref: (tile_b, in_dim) f32
       w_ref: (4, K_PAD, F_PAD) f32   zero-padded weight slab (VMEM-resident)
       b_ref: (4, 1, F_PAD)     f32   zero-padded bias slab   (VMEM-resident)
       out_ref: (tile_b, in_dim) f32
       xpad_ref: (tile_b, K_PAD) f32  VMEM scratch for lane zero-padding of x."""
    in_dim = x_ref.shape[1]

    # Zero-pad x's feature lanes to K_PAD inside VMEM (padded weight rows are
    # zero, so the padded lanes contribute nothing to any contraction).
    xpad_ref[...] = jnp.zeros_like(xpad_ref)
    xpad_ref[:, :in_dim] = x_ref[...]
    x = xpad_ref[...]

    # Layer 1: Linear(in_dim -> 8) + ReLU
    h = jnp.dot(x, w_ref[0], preferred_element_type=jnp.float32) + b_ref[0]
    h = jnp.maximum(h, 0.0)
    # Layer 2: Linear(8 -> latent) + ReLU   (K operand: first K_PAD lanes)
    h = jnp.dot(h[:, :K_PAD], w_ref[1], preferred_element_type=jnp.float32) + b_ref[1]
    h = jnp.maximum(h, 0.0)
    # Layer 3: Linear(latent -> 8) + ReLU
    h = jnp.dot(h[:, :K_PAD], w_ref[2], preferred_element_type=jnp.float32) + b_ref[2]
    h = jnp.maximum(h, 0.0)
    # Layer 4: Linear(8 -> in_dim), no activation
    out = jnp.dot(h[:, :K_PAD], w_ref[3], preferred_element_type=jnp.float32) + b_ref[3]

    # Narrow store at native output width (masked vst; avoids 12.8x HBM
    # writeback inflation of a 128-lane padded output).
    out_ref[...] = out[:, :in_dim].astype(out_ref.dtype)


def pack_params(params):
    """Build the zero-padded, lane-aligned weight/bias slabs ONCE (not per call).

    Weights are (fan_in, fan_out); biases are (1, fan_out) or (fan_out,)."""
    w_slab = jnp.zeros((4, K_PAD, F_PAD), jnp.float32)
    b_slab = jnp.zeros((4, 1, F_PAD), jnp.float32)
    for i in range(4):
        w = jnp.asarray(params[f"w{i + 1}"], jnp.float32)
        b = jnp.asarray(params[f"b{i + 1}"], jnp.float32).reshape(-1)
        fan_in, fan_out = w.shape
        w_slab = w_slab.at[i, :fan_in, :fan_out].set(w)
        b_slab = b_slab.at[i, 0, :fan_out].set(b)
    return w_slab, b_slab


@functools.partial(jax.jit, static_argnames=("force_pallas",))
def simple_autoencoder_forward(x, w_slab, b_slab, *, force_pallas=False):
    """x: (batch, input_dim) f32; w_slab/b_slab from pack_params()."""
    batch, input_dim = x.shape

    if not force_pallas and batch < PALLAS_MIN_BATCH:
        # Small-batch fallback: the kernel's fixed launch/DMA overhead dwarfs
        # the ~KFLOPs of real compute, so plain (fusible) jnp wins here.
        h = jnp.pad(x, ((0, 0), (0, K_PAD - input_dim)))
        for i in range(4):
            h = jnp.dot(h[:, :K_PAD], w_slab[i]) + b_slab[i]
            if i < 3:
                h = jnp.maximum(h, 0.0)
        return h[:, :input_dim]

    tile_b = min(TILE_B_MAX, _round_up(batch, 8))
    batch_pad = _round_up(batch, tile_b)
    grid_b = batch_pad // tile_b

    x_in = x
    if batch_pad != batch:
        x_in = jnp.pad(x, ((0, batch_pad - batch), (0, 0)))

    # Padded work the kernel actually performs (advisory for XLA scheduling).
    flops = 2 * batch_pad * K_PAD * F_PAD * 4
    bytes_accessed = 4 * (2 * batch_pad * input_dim      # x in + out out
                          + 4 * K_PAD * F_PAD            # weight slab
                          + 4 * F_PAD)                   # bias slab

    out = pl.pallas_call(
        _autoencoder_kernel,
        out_shape=jax.ShapeDtypeStruct((batch_pad, input_dim), jnp.float32),
        grid_spec=pltpu.PrefetchScalarGridSpec(
            num_scalar_prefetch=0,
            grid=(grid_b,),
            in_specs=[
                # x tile at NATIVE width: last block dim == full array dim.
                pl.BlockSpec((tile_b, input_dim), lambda i: (i, 0)),
                # weight slab: same block every step -> stays VMEM-resident.
                pl.BlockSpec((4, K_PAD, F_PAD), lambda i: (0, 0, 0)),
                # bias slab: same block every step -> stays VMEM-resident.
                pl.BlockSpec((4, 1, F_PAD), lambda i: (0, 0, 0)),
            ],
            out_specs=pl.BlockSpec((tile_b, input_dim), lambda i: (i, 0)),
            scratch_shapes=[pltpu.VMEM((tile_b, K_PAD), jnp.float32)],
        ),
        compiler_params=pltpu.CompilerParams(
            # Batch axis is independent across tiles.  On v7x, CORE_PARALLEL /
            # pl.core_map over a tensorcore mesh would shard this axis across
            # both TensorCores; kept as plain "parallel" here for portability.
            dimension_semantics=("parallel",),
        ),
        cost_estimate=pl.CostEstimate(
            flops=flops, transcendentals=0, bytes_accessed=bytes_accessed),
    )(x_in, w_slab, b_slab)

    if batch_pad != batch:
        out = out[:batch]
    return out


def init_params(key, input_dim=10, latent_dim=4):
    """Deterministic synthetic init mirroring PyTorch Linear's default scale.
    Weights stored as (in_features, out_features); biases as (1, out_features)."""
    dims = [(input_dim, 8), (8, latent_dim), (latent_dim, 8), (8, input_dim)]
    params = {}
    for idx, (fan_in, fan_out) in enumerate(dims, start=1):
        key, kw, kb = jax.random.split(key, 3)
        bound = 1.0 / jnp.sqrt(fan_in)
        params[f"w{idx}"] = jax.random.uniform(
            kw, (fan_in, fan_out), jnp.float32, -bound, bound)
        params[f"b{idx}"] = jax.random.uniform(
            kb, (1, fan_out), jnp.float32, -bound, bound)
    return params


def _reference_forward(x, p):
    h = jnp.maximum(x @ p["w1"] + p["b1"], 0.0)
    z = jnp.maximum(h @ p["w2"] + p["b2"], 0.0)
    h = jnp.maximum(z @ p["w3"] + p["b3"], 0.0)
    return h @ p["w4"] + p["b4"]


if __name__ == "__main__":
    key = jax.random.PRNGKey(0)
    key, kx = jax.random.split(key)

    batch, input_dim, latent_dim = 8, 10, 4
    x = jax.random.normal(kx, (batch, input_dim), jnp.float32)
    params = init_params(key, input_dim=input_dim, latent_dim=latent_dim)

    # One-time packing outside the hot path.
    w_slab, b_slab = pack_params(params)

    # force_pallas=True so the Pallas kernel is exercised even at batch=8
    # (the production dispatch would take the jnp path below PALLAS_MIN_BATCH).
    out = simple_autoencoder_forward(x, w_slab, b_slab, force_pallas=True)
    out = jax.block_until_ready(out)

    ref = _reference_forward(x, params)
    assert out.shape == (batch, input_dim)
    # Tolerance allows for MXU f32 multi-pass / contraction-order differences
    # between the Pallas matmuls and the XLA reference dots.
    assert jnp.allclose(out, ref, atol=5e-3, rtol=5e-3), (
        f"max abs err {jnp.max(jnp.abs(out - ref))}")

    print("KERNEL_OK")
</pallas_src>

<mosaic_0001>
module attributes {stable_mosaic.version = 11 : i64} {
  func.func @_autoencoder_kernel(%arg0: i32, %arg1: memref<8x10xf32, #tpu.memory_space<vmem>>, %arg2: memref<4x16x128xf32, #tpu.memory_space<vmem>>, %arg3: memref<4x1x128xf32, #tpu.memory_space<vmem>>, %arg4: memref<8x10xf32, #tpu.memory_space<vmem>>, %arg5: memref<8x16xf32, #tpu.memory_space<vmem>>) attributes {dimension_semantics = [#tpu.dimension_semantics<parallel>], iteration_bounds = array<i64: 1>, scalar_prefetch = 0 : i64, scratch_operands = 1 : i64, tpu.core_type = #tpu.core_type<tc>, window_params = [{transform_indices = @transform_0, window_bounds = array<i64: 8, 10>}, {pipeline_mode = #tpu.pipeline_mode<synchronous>, transform_indices = @transform_1, window_bounds = array<i64: 4, 16, 128>}, {pipeline_mode = #tpu.pipeline_mode<synchronous>, transform_indices = @transform_2, window_bounds = array<i64: 4, 1, 128>}, {transform_indices = @transform_3, window_bounds = array<i64: 8, 10>}]} {
    %cst = arith.constant 0.000000e+00 : f32
    %0 = vector.broadcast %cst : f32 to vector<8x16xf32>
    %c0 = arith.constant 0 : index
    %c0_0 = arith.constant 0 : index
    %1 = vector.load %arg5[%c0, %c0_0] : memref<8x16xf32, #tpu.memory_space<vmem>>, vector<8x16xf32>
    tpu.vector_store %arg5[%c0, %c0_0], %0 {strides = array<i32>} : memref<8x16xf32, #tpu.memory_space<vmem>>, vector<8x16xf32>,
    %c0_1 = arith.constant 0 : index
    %c0_2 = arith.constant 0 : index
    %2 = vector.load %arg1[%c0_1, %c0_2] : memref<8x10xf32, #tpu.memory_space<vmem>>, vector<8x10xf32>
    %c0_3 = arith.constant 0 : index
    %c0_4 = arith.constant 0 : index
    %3 = vector.load %arg5[%c0_3, %c0_4] : memref<8x16xf32, #tpu.memory_space<vmem>>, vector<8x10xf32>
    tpu.vector_store %arg5[%c0_3, %c0_4], %2 {strides = array<i32>} : memref<8x16xf32, #tpu.memory_space<vmem>>, vector<8x10xf32>,
    %c0_5 = arith.constant 0 : index
    %c0_6 = arith.constant 0 : index
    %4 = vector.load %arg5[%c0_5, %c0_6] : memref<8x16xf32, #tpu.memory_space<vmem>>, vector<8x16xf32>
    %c0_7 = arith.constant 0 : index
    %c0_8 = arith.constant 0 : index
    %c0_9 = arith.constant 0 : index
    %5 = vector.load %arg2[%c0_7, %c0_8, %c0_9] : memref<4x16x128xf32, #tpu.memory_space<vmem>>, vector<1x16x128xf32>
    %6 = vector.shape_cast %5 : vector<1x16x128xf32> to vector<16x128xf32>
    %cst_10 = arith.constant dense<0.000000e+00> : vector<8x128xf32>
    %7 = tpu.matmul %4, %6, %cst_10 {dimension_numbers = #tpu.dot_dimension_numbers<[1], [0], [0], [1], [0, 0, 1, 1], [], []>} : vector<8x16xf32>, vector<16x128xf32>, vector<8x128xf32> -> vector<8x128xf32>
    %c0_11 = arith.constant 0 : index
    %c0_12 = arith.constant 0 : index
    %c0_13 = arith.constant 0 : index
    %8 = vector.load %arg3[%c0_11, %c0_12, %c0_13] : memref<4x1x128xf32, #tpu.memory_space<vmem>>, vector<1x1x128xf32>
    %9 = vector.shape_cast %8 : vector<1x1x128xf32> to vector<1x128xf32>
    %10 = vector.broadcast %9 : vector<1x128xf32> to vector<8x128xf32>
    %11 = arith.addf %7, %10 : vector<8x128xf32>
    %cst_14 = arith.constant 0.000000e+00 : f32
    %12 = vector.broadcast %cst_14 : f32 to vector<8x128xf32>
    %13 = arith.maximumf %11, %12 : vector<8x128xf32>
    %14 = vector.extract_strided_slice %13 {offsets = [0, 0], sizes = [8, 16], strides = [1, 1]} : vector<8x128xf32> to vector<8x16xf32>
    %c1 = arith.constant 1 : index
    %c0_15 = arith.constant 0 : index
    %c0_16 = arith.constant 0 : index
    %15 = vector.load %arg2[%c1, %c0_15, %c0_16] : memref<4x16x128xf32, #tpu.memory_space<vmem>>, vector<1x16x128xf32>
    %16 = vector.shape_cast %15 : vector<1x16x128xf32> to vector<16x128xf32>
    %cst_17 = arith.constant dense<0.000000e+00> : vector<8x128xf32>
    %17 = tpu.matmul %14, %16, %cst_17 {dimension_numbers = #tpu.dot_dimension_numbers<[1], [0], [0], [1], [0, 0, 1, 1], [], []>} : vector<8x16xf32>, vector<16x128xf32>, vector<8x128xf32> -> vector<8x128xf32>
    %c1_18 = arith.constant 1 : index
    %c0_19 = arith.constant 0 : index
    %c0_20 = arith.constant 0 : index
    %18 = vector.load %arg3[%c1_18, %c0_19, %c0_20] : memref<4x1x128xf32, #tpu.memory_space<vmem>>, vector<1x1x128xf32>
    %19 = vector.shape_cast %18 : vector<1x1x128xf32> to vector<1x128xf32>
    %20 = vector.broadcast %19 : vector<1x128xf32> to vector<8x128xf32>
    %21 = arith.addf %17, %20 : vector<8x128xf32>
    %cst_21 = arith.constant 0.000000e+00 : f32
    %22 = vector.broadcast %cst_21 : f32 to vector<8x128xf32>
    %23 = arith.maximumf %21, %22 : vector<8x128xf32>
    %24 = vector.extract_strided_slice %23 {offsets = [0, 0], sizes = [8, 16], strides = [1, 1]} : vector<8x128xf32> to vector<8x16xf32>
    %c2 = arith.constant 2 : index
    %c0_22 = arith.constant 0 : index
    %c0_23 = arith.constant 0 : index
    %25 = vector.load %arg2[%c2, %c0_22, %c0_23] : memref<4x16x128xf32, #tpu.memory_space<vmem>>, vector<1x16x128xf32>
    %26 = vector.shape_cast %25 : vector<1x16x128xf32> to vector<16x128xf32>
    %cst_24 = arith.constant dense<0.000000e+00> : vector<8x128xf32>
    %27 = tpu.matmul %24, %26, %cst_24 {dimension_numbers = #tpu.dot_dimension_numbers<[1], [0], [0], [1], [0, 0, 1, 1], [], []>} : vector<8x16xf32>, vector<16x128xf32>, vector<8x128xf32> -> vector<8x128xf32>
    %c2_25 = arith.constant 2 : index
    %c0_26 = arith.constant 0 : index
    %c0_27 = arith.constant 0 : index
    %28 = vector.load %arg3[%c2_25, %c0_26, %c0_27] : memref<4x1x128xf32, #tpu.memory_space<vmem>>, vector<1x1x128xf32>
    %29 = vector.shape_cast %28 : vector<1x1x128xf32> to vector<1x128xf32>
    %30 = vector.broadcast %29 : vector<1x128xf32> to vector<8x128xf32>
    %31 = arith.addf %27, %30 : vector<8x128xf32>
    %cst_28 = arith.constant 0.000000e+00 : f32
    %32 = vector.broadcast %cst_28 : f32 to vector<8x128xf32>
    %33 = arith.maximumf %31, %32 : vector<8x128xf32>
    %34 = vector.extract_strided_slice %33 {offsets = [0, 0], sizes = [8, 16], strides = [1, 1]} : vector<8x128xf32> to vector<8x16xf32>
    %c3 = arith.constant 3 : index
    %c0_29 = arith.constant 0 : index
    %c0_30 = arith.constant 0 : index
    %35 = vector.load %arg2[%c3, %c0_29, %c0_30] : memref<4x16x128xf32, #tpu.memory_space<vmem>>, vector<1x16x128xf32>
    %36 = vector.shape_cast %35 : vector<1x16x128xf32> to vector<16x128xf32>
    %cst_31 = arith.constant dense<0.000000e+00> : vector<8x128xf32>
    %37 = tpu.matmul %34, %36, %cst_31 {dimension_numbers = #tpu.dot_dimension_numbers<[1], [0], [0], [1], [0, 0, 1, 1], [], []>} : vector<8x16xf32>, vector<16x128xf32>, vector<8x128xf32> -> vector<8x128xf32>
    %c3_32 = arith.constant 3 : index
    %c0_33 = arith.constant 0 : index
    %c0_34 = arith.constant 0 : index
    %38 = vector.load %arg3[%c3_32, %c0_33, %c0_34] : memref<4x1x128xf32, #tpu.memory_space<vmem>>, vector<1x1x128xf32>
    %39 = vector.shape_cast %38 : vector<1x1x128xf32> to vector<1x128xf32>
    %40 = vector.broadcast %39 : vector<1x128xf32> to vector<8x128xf32>
    %41 = arith.addf %37, %40 : vector<8x128xf32>
    %42 = vector.extract_strided_slice %41 {offsets = [0, 0], sizes = [8, 10], strides = [1, 1]} : vector<8x128xf32> to vector<8x10xf32>
    %c0_35 = arith.constant 0 : index
    %c0_36 = arith.constant 0 : index
    %43 = vector.load %arg4[%c0_35, %c0_36] : memref<8x10xf32, #tpu.memory_space<vmem>>, vector<8x10xf32>
    tpu.vector_store %arg4[%c0_35, %c0_36], %42 {strides = array<i32>} : memref<8x10xf32, #tpu.memory_space<vmem>>, vector<8x10xf32>,
    return
  }
  func.func @transform_0(%arg0: i32) -> (i32, i32) {
    %c0_i32 = arith.constant 0 : i32
    %c0_i32_0 = arith.constant 0 : i32
    return %arg0, %c0_i32 : i32, i32
  }
  func.func @transform_1(%arg0: i32) -> (i32, i32, i32) {
    %c0_i32 = arith.constant 0 : i32
    %c0_i32_0 = arith.constant 0 : i32
    %c0_i32_1 = arith.constant 0 : i32
    %c0_i32_2 = arith.constant 0 : i32
    return %c0_i32, %c0_i32_0, %c0_i32_1 : i32, i32, i32
  }
  func.func @transform_2(%arg0: i32) -> (i32, i32, i32) {
    %c0_i32 = arith.constant 0 : i32
    %c0_i32_0 = arith.constant 0 : i32
    %c0_i32_1 = arith.constant 0 : i32
    %c0_i32_2 = arith.constant 0 : i32
    return %c0_i32, %c0_i32_0, %c0_i32_1 : i32, i32, i32
  }
  func.func @transform_3(%arg0: i32) -> (i32, i32) {
    %c0_i32 = arith.constant 0 : i32
    %c0_i32_0 = arith.constant 0 : i32
    return %arg0, %c0_i32 : i32, i32
  }
}

</mosaic_0001>

<bundles_post_ra>
// kernel: simple_autoencoder_forward.1
= control target key start
LH: loop header
LB: loop body
LE: loop exit
PB: predicated region body
PF: predicated region fallthrough
CT: control target
= control target key end

     0   :  { %8 = vsyncpa [#allocation4], 0  ;;  %s638_s0 = inlined_call_operand.hbm [shape: f32[8,10], index: 0, kind: input, shape index: {}]   ;;  %s639_s1 = inlined_call_operand.hbm [shape: f32[4,16,128], index: 1, kind: input, shape index: {}]   ;;  %s640_s2 = inlined_call_operand.vmem [shape: f32[4,1,128], index: 2, kind: input, shape index: {}]   ;;  %s641_s3 = inlined_call_operand.hbm [shape: f32[8,10], index: 3, kind: output, shape index: {}]  }
   0x1   :  { %9 = vsyncpa [#allocation7], 0 }
   0x2   :  { %10 = vsyncpa [#allocation5], 0  ;;  %s544_s12 = smov [#allocation3]   ;;  %s545_s14 = smov [#allocation6]  }
   0x3   :  { %s17_s13 = sshll.u32 %s544_s12, 4  ;;  %s26_s15 = sshll.u32 %s545_s14, 4  ;;  %s18_s13 = int_to_ptr.vmem [resolvable:$true] %s17_s13  ;;  %s572_s15 = int_to_ptr.vmem [resolvable:$true] %s26_s15 }
   0x4   :  { %s472_s18 = scalar_lea.hbm %s638_s0, 128 }
   0x5   :  { %p473_p0 = scmp.ne.s32.totalorder %s638_s0, %s472_s18  ;;  %p476_p1 = scmp.lt.u32.totalorder %s472_s18, %s638_s0 }
   0x7   :  { %p478_p2 = pnand %p476_p1, %p473_p0 }
   0x9   :  { %481 = shalt.err (!%p478_p2)
}
   0xa   :  { %s482_s23 = scalar_lea.vmem %s18_s13, 128  ;;  %p487_p4 = scmp.lt.s32.totalorder %s18_s13, %s18_s13 }
   0xb   :  { %p483_p3 = scmp.ne.s32.totalorder %s18_s13, %s482_s23  ;;  %p488_p5 = scmp.lt.s32.totalorder %s482_s23, %s482_s23 }
   0xd   :  { %p489_p6 = por %p488_p5, %p487_p4 }
   0xf   :  { %p490_p7 = pnand %p489_p6, %p483_p3 }
  0x11   :  { %493 = shalt.err (!%p490_p7)
}
  0x12   :  { %20 = dma.hbm_to_vmem [thread:$0]  %s638_s0, 128, %s18_s13, [#allocation4]  }
  0x13   :  { %s494_s28 = scalar_lea.hbm %s639_s1, 1024 }
  0x14   :  { %p495_p8 = scmp.ne.s32.totalorder %s639_s1, %s494_s28  ;;  %p498_p9 = scmp.lt.u32.totalorder %s494_s28, %s639_s1 }
  0x16   :  { %p500_p10 = pnand %p498_p9, %p495_p8 }
  0x18   :  { %503 = shalt.err (!%p500_p10)
}
  0x19   :  { %s504_s6 = scalar_lea.vmem %s572_s15, 1024  ;;  %p509_p12 = scmp.lt.s32.totalorder %s572_s15, %s572_s15 }
  0x1a   :  { %p505_p11 = scmp.ne.s32.totalorder %s572_s15, %s504_s6  ;;  %p510_p13 = scmp.lt.s32.totalorder %s504_s6, %s504_s6 }
  0x1c   :  { %p511_p0 = por %p510_p13, %p509_p12 }
  0x1e   :  { %p512_p1 = pnand %p511_p0, %p505_p11 }
  0x20   :  { %515 = shalt.err (!%p512_p1)
}
  0x21   :  { %s546_s0 = smov 128   ;;  %s547_s7 = smov 8  }
  0x22   :  { %32 = dma.hbm_to_vmem [thread:$0]  %s639_s1, 1024, %s572_s15, [#allocation7], %s546_s0, %s546_s0, %s547_s7  }
  0x23   :  { %538 = dma.done.wait [#allocation4], 128  }
  0x24   :  { %539 = vsyncadd [#allocation4], 4294967168 }
  0x25   :  { %540 = dma.done.wait [#allocation7], 1024  }
  0x26   :  { %541 = vsyncadd [#allocation7], 4294966272  ;;  %vm41_vm0 = vcmask 130048   ;;  %v548_v0 = vmov 0.0|0.0   ;;  %vm549_vm1 = vmmov 0   ;;  %v550_v1 = vmov 0.0  }
  0x27   :  { %452 = vmatprep.subr.bf16.mxu0 %v548_v0  ;;  %428 = vmatprep.mubr.msk.f32.mxu0 %vm549_vm1, %v550_v1  ;;  %42 = vst.msk [vmem:[#allocation2] sm:$0xff] %vm41_vm0, %v550_v1  ;;  %vm44_vm2 = vcmask 80896   ;;  %v47_v2 = vld [vmem:[#allocation6] sm:$0xff]  ;;  %v48_v3 = vld [vmem:[#allocation6 + $0x8] sm:$0xff]  ;;  %v43_v4 = vld [vmem:[#allocation3] sm:$0xff]  ;;  %s551_s17 = smov [#allocation8]  }
  0x28   :  { %455 = vmatprep.subr.bf16.mxu1 %v548_v0  ;;  %435 = vmatprep.mubr.msk.f32.mxu1 %vm549_vm1, %v550_v1  ;;  %v453_v5 = vpack.c.bf16 %v48_v3, %v47_v2  ;;  %45 = vst.msk [vmem:[#allocation2] sm:$0xff] %vm44_vm2, %v43_v4  ;;  %v131_v7 = vld [vmem:[#allocation6 + $0x10] sm:$0xff]  ;;  %v132_v8 = vld [vmem:[#allocation6 + $0x18] sm:$0xff]  ;;  %v216_v15 = vld [vmem:[#allocation6 + $0x20] sm:$0xff]  ;;  %s391_s18 = sshll.u32 %s551_s17, 4  ;;  %s392_s18 = int_to_ptr.vmem [resolvable:$true] %s391_s18 }
  0x29   :  { %v456_v9 = vpack.c.bf16 %v132_v8, %v131_v7  ;;  %v401_v10 = vld [vmem:[%s640_s2] ss:$0 sm:$0xff]  ;;  %v217_v16 = vld [vmem:[#allocation6 + $0x28] sm:$0xff]  ;;  %v404_v18 = vld [vmem:[%s640_s2 + $0x1] ss:$0 sm:$0xff]  ;;  %s516_s19 = scalar_lea.vmem %s392_s18, 128  ;;  %p521_p3 = scmp.lt.s32.totalorder %s392_s18, %s392_s18 }
  0x2a   :  { %454 = vmatpush3.bf16.msra.mxu0 %v453_v5  ;;  %v459_v17 = vpack.c.bf16 %v217_v16, %v216_v15  ;;  %v301_v23 = vld [vmem:[#allocation6 + $0x30] sm:$0xff]  ;;  %v302_v24 = vld [vmem:[#allocation6 + $0x38] sm:$0xff]  ;;  %p517_p2 = scmp.ne.s32.totalorder %s392_s18, %s516_s19  ;;  %p522_p4 = scmp.lt.s32.totalorder %s516_s19, %s516_s19 }
  0x2b   :  { %458 = vmatprep.subr.bf16.mxu0 %v548_v0  ;;  %457 = vmatpush3.bf16.msra.mxu1 %v456_v9  ;;  %v462_v25 = vpack.c.bf16 %v302_v24, %v301_v23  ;;  %v407_v26 = vld [vmem:[%s640_s2 + $0x2] ss:$0 sm:$0xff]  ;;  %v410_v31 = vld [vmem:[%s640_s2 + $0x3] ss:$0 sm:$0xff] }
  0x2c   :  { %461 = vmatprep.subr.bf16.mxu1 %v548_v0  ;;  %p523_p5 = por %p522_p4, %p521_p3 }
  0x2e   :  { %p524_p6 = pnand %p523_p5, %p517_p2 }
  0x2f   :  { %v46_v6 = vld [vmem:[#allocation2] sm:$0xff] }
  0x30   :  { %429 = vmatmul.mubr.msk.f32.vlgmr.msra.gmra.mrb[0].mxu0 %vm41_vm0, %v46_v6 }
  0x31   :  { %442 = vmatprep.mubr.msk.f32.mxu0 %vm549_vm1, %v550_v1  ;;  %460 = vmatpush3.bf16.msra.mxu0 %v459_v17 }
 0x103   :  { %v125_v11 = vpop.f32.mrb[0].mxu0 }
 0x104   :  { %v126_v12 = vadd.f32 %v401_v10, %v125_v11  ;;  %v430_v13 = vpop.f32.mrb[1].mxu0 }
 0x106   :  { %v129_v14 = vmax.f32 %v126_v12, 0.0 }
 0x108   :  { %436 = vmatmul.mubr.msk.f32.vlgmr.msra.gmra.mrb[0].mxu1 %vm41_vm0, %v129_v14 }
 0x109   :  { %449 = vmatprep.mubr.msk.f32.mxu1 %vm549_vm1, %v550_v1  ;;  %463 = vmatpush3.bf16.msra.mxu1 %v462_v25 }
 0x1db   :  { %v210_v19 = vpop.f32.mrb[0].mxu1 }
 0x1dc   :  { %v211_v20 = vadd.f32 %v404_v18, %v210_v19  ;;  %v437_v21 = vpop.f32.mrb[1].mxu1 }
 0x1de   :  { %v214_v22 = vmax.f32 %v211_v20, 0.0 }
 0x1e0   :  { %443 = vmatmul.mubr.msk.f32.vlgmr.msra.gmra.mrb[2].mxu0 %vm41_vm0, %v214_v22 }
 0x2b3   :  { %v295_v27 = vpop.f32.mrb[2].mxu0 }
 0x2b4   :  { %v296_v28 = vadd.f32 %v407_v26, %v295_v27  ;;  %v444_v29 = vpop.f32.mrb[3].mxu0 }
 0x2b6   :  { %v299_v30 = vmax.f32 %v296_v28, 0.0 }
 0x2b8   :  { %450 = vmatmul.mubr.msk.f32.vlgmr.msra.gmra.mrb[2].mxu1 %vm41_vm0, %v299_v30 }
 0x38b   :  { %v380_v32 = vpop.f32.mrb[2].mxu1 }
 0x38c   :  { %v381_v33 = vadd.f32 %v410_v31, %v380_v32  ;;  %v451_v34 = vpop.f32.mrb[3].mxu1 }
 0x38e   :  { %384 = vst.msk [vmem:[#allocation8] sm:$0xff] %vm44_vm2, %v381_v33 }
 0x38f   :  { %527 = shalt.err (!%p524_p6)
}
 0x390   :  { %s528_s22 = scalar_lea.hbm %s641_s3, 128 }
 0x391   :  { %p529_p7 = scmp.ne.s32.totalorder %s641_s3, %s528_s22  ;;  %p532_p8 = scmp.lt.u32.totalorder %s528_s22, %s641_s3 }
 0x393   :  { %p534_p9 = pnand %p532_p8, %p529_p7 }
 0x395   :  { %537 = shalt.err (!%p534_p9)
}
 0x396   :  { %394 = dma.vmem_to_hbm [thread:$0]  %s392_s18, 128, %s641_s3, [#allocation5]  }
 0x397   :  { %542 = dma.done.wait [#allocation5], 128  }
 0x398   :  { %543 = vsyncadd [#allocation5], 4294967168 }
 0x399   :  { %398 = vsyncpa [#allocation4], 1 }
 0x39a   :  { %399 = vsyncpa [#allocation7], 1 }
 0x39b   :  { %400 = vsyncpa [#allocation5], 1 }

</bundles_post_ra>
